<compile_context>
chip_gen: v6e
topology: v6e:2x2x1
jax: 0.10.0
libtpu: 0.0.40
codegen_flags: <defaults>
</compile_context>

<pallas_src>
import functools

import jax
import jax.numpy as jnp
from jax import lax
from jax.experimental import pallas as pl
from jax.experimental.pallas import tpu as pltpu


_NEG_FILL = float(jnp.finfo(jnp.float32).min)   # torch.finfo(dtype).min


def _round_up(x, m):
    return (x + m - 1) // m * m


def _vmem_budgets():
    """Generation-aware (vmem_limit_bytes, per-block tile budget)."""
    try:
        cap = int(pltpu.get_tpu_info().vmem_capacity_bytes)
    except Exception:                      # pragma: no cover - conservative fallback
        cap = 64 << 20
    vmem_limit = max(32 << 20, min(cap * 3 // 4, 100 << 20))   # ~96MiB v5e/v6e, ~48MiB v7x
    tile_budget = max(4 << 20, min(vmem_limit // 6, 16 << 20))  # ~16MiB v5e/v6e, ~8MiB v7x
    return vmem_limit, tile_budget


def _pick_batch_tile(B, per_row_bytes, budget):
    """Largest multiple-of-8 batch tile whose block fits `budget` (clamped to B)."""
    if B <= 8:
        return B
    tb = (budget // max(per_row_bytes, 1)) // 8 * 8
    return max(8, min(B, tb))


def _normalize(reps):
    # F.normalize(dim=-1, eps=1e-12)  ==  x * rsqrt(max(sum x^2, eps^2))
    ss = jnp.sum(reps * reps, axis=-1, keepdims=True)
    return reps * lax.rsqrt(jnp.maximum(ss, 1e-24))


# ----------------------------------------------------------------------------
# Kernel 1: sentence pooling (+ optional L2 normalize) == sentence_embedding()
# ----------------------------------------------------------------------------
def _cls_flat_kernel(normalized, h_ref, out_ref):
    # h_ref block is (tb, H): exactly the CLS rows (hidden viewed as [B, L*H]).
    reps = h_ref[...].astype(jnp.float32)
    if normalized:
        reps = _normalize(reps)
    out_ref[...] = reps.astype(out_ref.dtype)


def _cls_rows_kernel(normalized, h_ref, out_ref):
    # Fallback for H % 128 != 0: block is (tb, min(8, L), H); only row 0 is read.
    reps = h_ref[:, 0, :].astype(jnp.float32)
    if normalized:
        reps = _normalize(reps)
    out_ref[...] = reps.astype(out_ref.dtype)


def _mean_pool_kernel(normalized, L, tl, h_ref, m_ref, out_ref, sum_ref, cnt_ref):
    j = pl.program_id(1)

    @pl.when(j == 0)
    def _():
        sum_ref[...] = jnp.zeros_like(sum_ref)
        cnt_ref[...] = jnp.zeros_like(cnt_ref)

    h = h_ref[...].astype(jnp.float32)          # [tb, tl, H]
    m = m_ref[...].astype(jnp.float32)          # [tb, tl, 1]
    contrib = h * m
    if L % tl != 0:
        # Partial last seq tile: OOB block region is undefined -> mask it out.
        seq = j * tl + lax.broadcasted_iota(jnp.int32, (1, tl, 1), 1)
        valid = seq < L
        contrib = jnp.where(valid, contrib, 0.0)
        m = jnp.where(valid, m, 0.0)
    sum_ref[...] += jnp.sum(contrib, axis=1)    # [tb, H]
    cnt_ref[...] += jnp.sum(m, axis=1)          # [tb, 1]

    @pl.when(j == pl.num_programs(1) - 1)
    def _():
        # Plain divide (matches torch: all-padding rows -> inf / NaN).
        reps = sum_ref[...] / cnt_ref[...]
        if normalized:
            reps = _normalize(reps)
        out_ref[...] = reps.astype(out_ref.dtype)


def sentence_embedding(hidden, mask, *, method="cls", normalized=False):
    B, L, H = hidden.shape
    vmem_limit, budget = _vmem_budgets()
    itemsize = hidden.dtype.itemsize
    out_shape = jax.ShapeDtypeStruct((B, H), jnp.float32)

    if method == "cls":
        if H % 128 == 0 or L == 1:
            # Stream exactly the CLS row of every sequence.
            h2 = hidden.reshape(B, L * H)        # free row-major view
            tb = _pick_batch_tile(B, H * itemsize, budget)
            nb = pl.cdiv(B, tb)
            return pl.pallas_call(
                functools.partial(_cls_flat_kernel, normalized),
                grid=(nb,),
                in_specs=[pl.BlockSpec((tb, H), lambda i: (i, 0))],
                out_specs=pl.BlockSpec((tb, H), lambda i: (i, 0)),
                out_shape=out_shape,
                compiler_params=pltpu.CompilerParams(
                    dimension_semantics=("parallel",),
                    vmem_limit_bytes=vmem_limit),
            )(h2)
        # Fallback: stream the first min(8, L) seq rows (keeps (8,128) tiling rule).
        tl = L if L <= 8 else 8
        tb = _pick_batch_tile(B, tl * H * itemsize, budget)
        nb = pl.cdiv(B, tb)
        return pl.pallas_call(
            functools.partial(_cls_rows_kernel, normalized),
            grid=(nb,),
            in_specs=[pl.BlockSpec((tb, tl, H), lambda i: (i, 0, 0))],
            out_specs=pl.BlockSpec((tb, H), lambda i: (i, 0)),
            out_shape=out_shape,
            compiler_params=pltpu.CompilerParams(
                dimension_semantics=("parallel",),
                vmem_limit_bytes=vmem_limit),
        )(hidden)

    elif method == "mean":
        # Mask reshaped to [B, L, 1]: its lane dim is 1 (= full dim), so the seq
        # tile only needs to be a multiple of 8 for the hidden block.
        mask3 = mask.reshape(B, L, 1)
        full_row = L * H * itemsize
        tb_min = B if B <= 8 else 8
        if tb_min * full_row <= budget:
            tl = L
            tb = _pick_batch_tile(B, full_row, budget)
        else:
            tb = tb_min
            tl = min(L, max(8, (budget // max(tb * H * itemsize, 1)) // 8 * 8))
        nb, ns = pl.cdiv(B, tb), pl.cdiv(L, tl)
        return pl.pallas_call(
            functools.partial(_mean_pool_kernel, normalized, L, tl),
            grid=(nb, ns),
            in_specs=[pl.BlockSpec((tb, tl, H), lambda i, j: (i, j, 0)),
                      pl.BlockSpec((tb, tl, 1), lambda i, j: (i, j, 0))],
            out_specs=pl.BlockSpec((tb, H), lambda i, j: (i, 0)),
            out_shape=out_shape,
            scratch_shapes=[pltpu.VMEM((tb, H), jnp.float32),
                            pltpu.VMEM((tb, 1), jnp.float32)],
            compiler_params=pltpu.CompilerParams(
                dimension_semantics=("parallel", "arbitrary"),
                vmem_limit_bytes=vmem_limit),
        )(hidden, mask3)

    else:
        # TODO(synk): 'lasttoken' pooling not implemented.
        raise NotImplementedError(method)


# ----------------------------------------------------------------------------
# Kernel 2: similarity scores + expanded in-batch negatives + CE loss
#           (training branch of BiEncoderModel.forward, use_inbatch_neg=True)
# ----------------------------------------------------------------------------
def _make_scores_loss_kernel(Bq, Bp, group_size, tbq, inv_t, use_expanded, n_pad):
    dims = (((1,), (1,)), ((), ()))   # contract last dims of both operands
    n_cols = Bp + 2 * Bq if use_expanded else Bp

    def kernel(q_lhs_ref, p_ref, q_all_ref, ps_lhs_ref, ps_all_ref,
               scores_ref, nll_ref):
        i = pl.program_id(0)
        qt = q_lhs_ref[...]                                        # [tbq, H]

        s_qp = lax.dot_general(qt, p_ref[...], dims,
                               preferred_element_type=jnp.float32) * inv_t

        if n_pad > n_cols:
            scores_ref[...] = jnp.zeros_like(scores_ref)           # lane padding
        scores_ref[:, 0:Bp] = s_qp

        row_g = i * tbq + lax.broadcasted_iota(jnp.int32, (tbq, 1), 0)
        mx = jnp.max(s_qp, axis=-1, keepdims=True)

        if use_expanded:
            col_q = lax.broadcasted_iota(jnp.int32, (tbq, Bq), 1)
            # q . q^T with masked diagonal (masked_fill_ with finfo.min)
            s_qq = lax.dot_general(qt, q_all_ref[...], dims,
                                   preferred_element_type=jnp.float32) * inv_t
            s_qq = jnp.where(col_q == row_g, _NEG_FILL, s_qq)
            # p[target] . p[target]^T with masked diagonal
            s_pp = lax.dot_general(ps_lhs_ref[...], ps_all_ref[...], dims,
                                   preferred_element_type=jnp.float32) * inv_t
            s_pp = jnp.where(col_q == row_g, _NEG_FILL, s_pp)

            scores_ref[:, Bp:Bp + Bq] = s_qq
            scores_ref[:, Bp + Bq:Bp + 2 * Bq] = s_pp

            mx = jnp.maximum(mx, jnp.max(s_qq, axis=-1, keepdims=True))
            mx = jnp.maximum(mx, jnp.max(s_pp, axis=-1, keepdims=True))
            denom = (jnp.sum(jnp.exp(s_qp - mx), axis=-1, keepdims=True)
                     + jnp.sum(jnp.exp(s_qq - mx), axis=-1, keepdims=True)
                     + jnp.sum(jnp.exp(s_pp - mx), axis=-1, keepdims=True))
        else:
            denom = jnp.sum(jnp.exp(s_qp - mx), axis=-1, keepdims=True)

        # CrossEntropyLoss per-row term: lse - scores[r, target[r]],
        # with target[r] = r * group_size (always inside the q.p block).
        col_p = lax.broadcasted_iota(jnp.int32, (tbq, Bp), 1)
        tgt = jnp.sum(jnp.where(col_p == row_g * group_size, s_qp, 0.0),
                      axis=-1, keepdims=True)
        nll_ref[...] = (mx + jnp.log(denom)) - tgt

    return kernel


def _pick_q_tile(Bq):
    if Bq <= 8:
        return Bq
    return max(8, min(Bq, 256) // 8 * 8)


# ----------------------------------------------------------------------------
# Forward wrapper == BiEncoderModel.forward (training=True, use_inbatch_neg=True)
# ----------------------------------------------------------------------------
def bi_encoder_forward(q_hidden, q_mask, p_hidden, p_mask, *,
                       sentence_pooling_method="cls", normlized=False,
                       temperature=1.0, use_expaned_neg=True,
                       similarity_dtype=jnp.float32):
    if not normlized:
        temperature = 1.0   # __init__: reset temperature when not normalized

    q_reps = sentence_embedding(q_hidden, q_mask,
                                method=sentence_pooling_method, normalized=normlized)
    p_reps = sentence_embedding(p_hidden, p_mask,
                                method=sentence_pooling_method, normalized=normlized)

    Bq, H = q_reps.shape
    Bp = p_reps.shape[0]
    group_size = Bp // Bq
    n_cols = Bp + 2 * Bq if use_expaned_neg else Bp
    n_pad = _round_up(n_cols, 128)
    inv_t = 1.0 / float(temperature)

    # Optional bf16 reps for the MXU (f32 accumulation inside the kernel).
    q_in = q_reps.astype(similarity_dtype)
    p_in = p_reps.astype(similarity_dtype)
    # Positive passages p_reps[target]: tiny [Bq, H] strided slice in XLA.
    ps_in = p_in[::group_size]

    tbq = _pick_q_tile(Bq)
    nbq = pl.cdiv(Bq, tbq)
    vmem_limit, _ = _vmem_budgets()

    scores_pad, nll = pl.pallas_call(
        _make_scores_loss_kernel(Bq, Bp, group_size, tbq, inv_t,
                                 use_expaned_neg, n_pad),
        grid=(nbq,),
        in_specs=[pl.BlockSpec((tbq, H), lambda i: (i, 0)),   # q rows (LHS tile)
                  pl.BlockSpec((Bp, H), lambda i: (0, 0)),    # full p (RHS)
                  pl.BlockSpec((Bq, H), lambda i: (0, 0)),    # full q (RHS)
                  pl.BlockSpec((tbq, H), lambda i: (i, 0)),   # positives (LHS tile)
                  pl.BlockSpec((Bq, H), lambda i: (0, 0))],   # full positives (RHS)
        out_specs=[pl.BlockSpec((tbq, n_pad), lambda i: (i, 0)),
                   pl.BlockSpec((tbq, 1), lambda i: (i, 0))],
        out_shape=[jax.ShapeDtypeStruct((Bq, n_pad), jnp.float32),
                   jax.ShapeDtypeStruct((Bq, 1), jnp.float32)],
        compiler_params=pltpu.CompilerParams(
            dimension_semantics=("parallel",),
            vmem_limit_bytes=vmem_limit),
    )(q_in, p_in, q_in, ps_in, ps_in)

    scores = scores_pad[:, :n_cols]           # drop lane padding
    loss = jnp.mean(nll[:, 0])                # CrossEntropyLoss(reduction='mean')
    return loss, scores, q_reps, p_reps


# ----------------------------------------------------------------------------
# Pure-JAX reference (mirrors the PyTorch code) for verification
# ----------------------------------------------------------------------------
def _reference_forward(q_hidden, q_mask, p_hidden, p_mask, *,
                       sentence_pooling_method="cls", normlized=False,
                       temperature=1.0, use_expaned_neg=True,
                       similarity_dtype=jnp.float32):
    if not normlized:
        temperature = 1.0
    inv_t = 1.0 / float(temperature)

    def pool(h, m):
        h = h.astype(jnp.float32)
        m = m.astype(jnp.float32)
        if sentence_pooling_method == "mean":
            r = jnp.sum(h * m[:, :, None], axis=1) / jnp.sum(m, axis=1, keepdims=True)
        else:
            r = h[:, 0]
        if normlized:
            r = r / jnp.maximum(jnp.linalg.norm(r, axis=-1, keepdims=True), 1e-12)
        return r

    q_reps, p_reps = pool(q_hidden, q_mask), pool(p_hidden, p_mask)
    Bq, Bp = q_reps.shape[0], p_reps.shape[0]
    group_size = Bp // Bq
    target = jnp.arange(Bq) * group_size

    qc = q_reps.astype(similarity_dtype)
    pc = p_reps.astype(similarity_dtype)
    scores = jnp.dot(qc, pc.T, preferred_element_type=jnp.float32) * inv_t
    if use_expaned_neg:
        s_qq = jnp.dot(qc, qc.T, preferred_element_type=jnp.float32) * inv_t
        s_qq = jnp.where(jnp.eye(Bq, dtype=bool), _NEG_FILL, s_qq)
        psel = pc[target]
        s_pp = jnp.dot(psel, psel.T, preferred_element_type=jnp.float32) * inv_t
        s_pp = jnp.where(jnp.eye(Bq, dtype=bool), _NEG_FILL, s_pp)
        scores = jnp.concatenate([scores, s_qq, s_pp], axis=-1)
    logp = jax.nn.log_softmax(scores, axis=-1)
    loss = -jnp.mean(logp[jnp.arange(Bq), target])
    return loss, scores, q_reps, p_reps


if __name__ == "__main__":
    key = jax.random.PRNGKey(0)

    def make_inputs(k, Bq, group_size, L, H, hidden_dtype=jnp.float32):
        Bp = Bq * group_size
        k1, k2 = jax.random.split(k)
        q_hidden = jax.random.normal(k1, (Bq, L, H), dtype=jnp.float32).astype(hidden_dtype)
        p_hidden = jax.random.normal(k2, (Bp, L, H), dtype=jnp.float32).astype(hidden_dtype)
        q_mask = jnp.concatenate([jnp.ones((Bq, L - 2)), jnp.zeros((Bq, 2))],
                                 axis=1).astype(jnp.float32)
        p_mask = jnp.concatenate([jnp.ones((Bp, L - 3)), jnp.zeros((Bp, 3))],
                                 axis=1).astype(jnp.float32)
        return q_hidden, q_mask, p_hidden, p_mask

    ka, kb, kc = jax.random.split(key, 3)
    inputs_a = make_inputs(ka, Bq=2, group_size=4, L=16, H=128)              # H%128==0 path
    inputs_a_bf16 = make_inputs(kb, Bq=2, group_size=4, L=16, H=128,
                                hidden_dtype=jnp.bfloat16)                   # bf16 streaming
    inputs_b = make_inputs(kc, Bq=2, group_size=4, L=8, H=32)                # fallback path

    def check(inputs, cfg, tol):
        loss, scores, q_reps, p_reps = bi_encoder_forward(*inputs, **cfg)
        jax.block_until_ready((loss, scores, q_reps, p_reps))
        rl, rs, rq, rp = _reference_forward(*inputs, **cfg)
        assert jnp.allclose(q_reps, rq, rtol=1e-4, atol=1e-4), cfg
        assert jnp.allclose(p_reps, rp, rtol=1e-4, atol=1e-4), cfg
        assert jnp.allclose(scores, rs, rtol=tol, atol=tol), cfg
        assert jnp.allclose(loss, rl, rtol=tol, atol=tol), cfg

    configs = [
        # (inputs, config, tolerance)
        (inputs_a, dict(sentence_pooling_method="cls", normlized=False,
                        temperature=1.0), 1e-4),                              # module defaults
        (inputs_a, dict(sentence_pooling_method="cls", normlized=True,
                        temperature=0.05, use_expaned_neg=False), 1e-4),      # no expanded negs
        (inputs_a, dict(sentence_pooling_method="mean", normlized=True,
                        temperature=0.05), 1e-4),                             # mean + cosine
        (inputs_a, dict(sentence_pooling_method="mean", normlized=True,
                        temperature=0.05, similarity_dtype=jnp.bfloat16), 2e-2),  # bf16 MXU
        (inputs_a_bf16, dict(sentence_pooling_method="mean",
                             normlized=False), 1e-4),                         # bf16 hidden
        (inputs_b, dict(sentence_pooling_method="cls", normlized=False), 1e-4),   # H%128!=0
        (inputs_b, dict(sentence_pooling_method="mean", normlized=True,
                        temperature=0.05), 1e-4),
    ]
    for inputs, cfg, tol in configs:
        check(inputs, cfg, tol)

    print("KERNEL_OK")
</pallas_src>

<mosaic_0001>
module attributes {stable_mosaic.version = 11 : i64} {
  func.func @_cls_flat_kernel(%arg0: i32, %arg1: memref<2x128xf32, #tpu.memory_space<vmem>>, %arg2: memref<2x128xf32, #tpu.memory_space<vmem>>) attributes {dimension_semantics = [#tpu.dimension_semantics<parallel>], iteration_bounds = array<i64: 1>, scalar_prefetch = 0 : i64, scratch_operands = 0 : i64, tpu.core_type = #tpu.core_type<tc>, window_params = [{transform_indices = @transform_0, window_bounds = array<i64: 2, 128>}, {transform_indices = @transform_1, window_bounds = array<i64: 2, 128>}]} {
    %c0 = arith.constant 0 : index
    %c0_0 = arith.constant 0 : index
    %0 = vector.load %arg1[%c0, %c0_0] : memref<2x128xf32, #tpu.memory_space<vmem>>, vector<2x128xf32>
    %c0_1 = arith.constant 0 : index
    %c0_2 = arith.constant 0 : index
    %1 = vector.load %arg2[%c0_1, %c0_2] : memref<2x128xf32, #tpu.memory_space<vmem>>, vector<2x128xf32>
    tpu.vector_store %arg2[%c0_1, %c0_2], %0 {strides = array<i32>} : memref<2x128xf32, #tpu.memory_space<vmem>>, vector<2x128xf32>,
    return
  }
  func.func @transform_0(%arg0: i32) -> (i32, i32) {
    %c0_i32 = arith.constant 0 : i32
    %c0_i32_0 = arith.constant 0 : i32
    return %arg0, %c0_i32 : i32, i32
  }
  func.func @transform_1(%arg0: i32) -> (i32, i32) {
    %c0_i32 = arith.constant 0 : i32
    %c0_i32_0 = arith.constant 0 : i32
    return %arg0, %c0_i32 : i32, i32
  }
}

</mosaic_0001>

<bundles_post_ra>
// kernel: tpu_custom_call.1
= control target key start
LH: loop header
LB: loop body
LE: loop exit
PB: predicated region body
PF: predicated region fallthrough
CT: control target
= control target key end

     0   :  { %6 = vsyncpa [#allocation3], 0  ;;  %s102_s0 = inlined_call_operand.hbm [shape: f32[2,2048], index: 0, kind: input, shape index: {}]   ;;  %s103_s1 = inlined_call_operand.hbm [shape: f32[2,128], index: 1, kind: output, shape index: {}]  }
   0x1   :  { %7 = vsyncpa [#allocation4], 0  ;;  %s84_s6 = smov [#allocation2]  }
   0x2   :  { %s14_s7 = sshll.u32 %s84_s6, 4  ;;  %s15_s7 = int_to_ptr.vmem [resolvable:$true] %s14_s7 }
   0x3   :  { %s48_s8 = scalar_lea.vmem %s15_s7, 32  ;;  %p53_p1 = scmp.lt.s32.totalorder %s15_s7, %s15_s7 }
   0x4   :  { %p49_p0 = scmp.ne.s32.totalorder %s15_s7, %s48_s8  ;;  %p54_p2 = scmp.lt.s32.totalorder %s48_s8, %s48_s8 }
   0x6   :  { %p55_p3 = por %p54_p2, %p53_p1 }
   0x8   :  { %p56_p4 = pnand %p55_p3, %p49_p0 }
   0xa   :  { %59 = shalt.err (!%p56_p4)
}
   0xb   :  { %17 = dma.hbm_to_vmem [thread:$0]  %s102_s0, 32, %s15_s7, [#allocation3]  }
   0xc   :  { %80 = dma.done.wait [#allocation3], 32  }
   0xd   :  { %81 = vsyncadd [#allocation3], 4294967264  ;;  %s85_s11 = smov [#allocation5]   ;;  %v21_v0 = vld [vmem:[#allocation2] sm:$0x3] }
   0xe   :  { %s29_s12 = sshll.u32 %s85_s11, 4  ;;  %22 = vst [vmem:[#allocation5] sm:$0x3] %v21_v0  ;;  %s30_s12 = int_to_ptr.vmem [resolvable:$true] %s29_s12 }
   0xf   :  { %s60_s13 = scalar_lea.vmem %s30_s12, 32  ;;  %p65_p6 = scmp.lt.s32.totalorder %s30_s12, %s30_s12 }
  0x10   :  { %p61_p5 = scmp.ne.s32.totalorder %s30_s12, %s60_s13  ;;  %p66_p7 = scmp.lt.s32.totalorder %s60_s13, %s60_s13 }
  0x12   :  { %p67_p8 = por %p66_p7, %p65_p6 }
  0x14   :  { %p68_p9 = pnand %p67_p8, %p61_p5 }
  0x16   :  { %71 = shalt.err (!%p68_p9)
}
  0x17   :  { %32 = dma.vmem_to_hbm [thread:$0]  %s30_s12, 32, %s103_s1, [#allocation4]  }
  0x18   :  { %82 = dma.done.wait [#allocation4], 32  }
  0x19   :  { %83 = vsyncadd [#allocation4], 4294967264 }
  0x1a   :  { %36 = vsyncpa [#allocation3], 1 }
  0x1b   :  { %37 = vsyncpa [#allocation4], 1 }

</bundles_post_ra>
